<compile_context>
chip_gen: v7x
topology: tpu7x:2x2x1
jax: 0.10.0
libtpu: 0.0.40
codegen_flags: <defaults>
</compile_context>

<pallas_src>
import functools

import jax
import jax.numpy as jnp
from jax.experimental import pallas as pl
from jax.experimental.pallas import tpu as pltpu

EPS = 1e-5

_LANE = 128
_SUBLANE = 8
_VREG_ELEMS = _LANE * _SUBLANE            # 1024 f32 elements per vreg
_VMEM_BLOCK_BUDGET = 40 * 1024 * 1024     # bytes available when sizing blocks
_VMEM_LIMIT_BYTES = 64 * 1024 * 1024      # <= v7x physical VMEM per TC
_COLLAPSE_GRID_BYTES = 2 * 1024 * 1024    # below this, one grid step is best


def _sum_last2(x):
    """Per-sample sum over the last two axes of a (NB, A, B) block."""
    s = jnp.sum(x, axis=2, keepdims=True)      # cross-lane reduce (XLU)
    return jnp.sum(s, axis=1, keepdims=True)   # cross-sublane reduce (XLU)


def _gn1_channels_kernel(x_ref, gamma_ref, beta_ref, o_ref, *, inv_count):
    # x_ref: (NB, C, HW); gamma_ref/beta_ref: (C, 1) f32.
    xf = x_ref[...].astype(jnp.float32)

    # One-pass stats per sample.
    s1 = _sum_last2(xf)
    s2 = _sum_last2(xf * xf)
    mean = s1 * inv_count
    var = jnp.maximum(s2 * inv_count - mean * mean, 0.0)
    inv_std = jax.lax.rsqrt(var + EPS)                       # (NB, 1, 1)

    # Fused affine: tiny per-(sample, channel) scale/shift temporaries, then a
    # single 2-op full-size pass y = x * scale + shift.
    gamma = gamma_ref[...][None, :, :]                       # (1, C, 1)
    beta = beta_ref[...][None, :, :]                         # (1, C, 1)
    scale = gamma * inv_std                                  # (NB, C, 1)
    shift = beta - mean * scale                              # (NB, C, 1)

    o_ref[...] = (xf * scale + shift).astype(o_ref.dtype)


def _gn1_slab_kernel(x_ref, gamma_ref, beta_ref, o_ref, *, inv_count):
    # x_ref: (NB, R, 128) (possibly zero-padded) slab.
    # gamma_ref/beta_ref: (R, 128) f32, pre-expanded per-channel params
    # (zero in any padded tail, so padded outputs are just 0).
    xf = x_ref[...].astype(jnp.float32)

    s1 = _sum_last2(xf)
    s2 = _sum_last2(xf * xf)
    mean = s1 * inv_count
    var = jnp.maximum(s2 * inv_count - mean * mean, 0.0)
    inv_std = jax.lax.rsqrt(var + EPS)                       # (NB, 1, 1)

    gamma = gamma_ref[...][None, :, :]                       # (1, R, 128)
    beta = beta_ref[...][None, :, :]                         # (1, R, 128)

    # scale/shift here are full-slab sized (per-channel varies within a lane
    # row), so keep the classic (x - mean) * inv_std form and fuse the affine.
    x_hat = (xf - mean) * inv_std
    o_ref[...] = (x_hat * gamma + beta).astype(o_ref.dtype)


def _largest_divisor_leq(n, cap):
    cap = max(1, min(n, cap))
    for d in range(cap, 0, -1):
        if n % d == 0:
            return d
    return 1


def _choose_samples_per_step(n, per_sample_vmem_bytes, raw_sample_bytes,
                             resident_bytes=0):
    """How many samples each grid step owns."""
    budget = max(1, _VMEM_BLOCK_BUDGET - resident_bytes)
    by_vmem = max(1, budget // max(1, per_sample_vmem_bytes))
    nb = _largest_divisor_leq(n, by_vmem)
    # Keep >= 2 grid steps for non-tiny workloads so both v7x TCs get work.
    if nb == n and n >= 2 and n * raw_sample_bytes > _COLLAPSE_GRID_BYTES:
        nb = _largest_divisor_leq(n, n // 2)
    return nb


def _run_channel_layout(x_nchw, gamma_f, beta_f, inv_count, compiler_params):
    N, C, H, W = x_nchw.shape
    HW = H * W
    dtype = x_nchw.dtype
    itemsize = jnp.dtype(dtype).itemsize
    elems = C * HW

    # per-sample VMEM: double-buffered in + out blocks + ~2 f32 temporaries.
    per_sample = elems * (4 * itemsize + 2 * 4)
    nb = _choose_samples_per_step(N, per_sample, elems * itemsize)
    # TODO(synk): if a single sample (nb == 1) still exceeds the VMEM budget
    # (huge C*H*W on v7x's 64 MiB), restructure to a tiled two-pass
    # (stats pass + normalize pass) over HW tiles.

    x3 = x_nchw.reshape(N, C, HW)
    gamma2 = gamma_f.reshape(C, 1)
    beta2 = beta_f.reshape(C, 1)

    kernel = functools.partial(_gn1_channels_kernel, inv_count=inv_count)
    out3 = pl.pallas_call(
        kernel,
        out_shape=jax.ShapeDtypeStruct((N, C, HW), dtype),
        grid_spec=pltpu.PrefetchScalarGridSpec(
            num_scalar_prefetch=0,
            grid=(N // nb,),
            in_specs=[
                pl.BlockSpec((nb, C, HW), lambda n: (n, 0, 0)),
                pl.BlockSpec((C, 1), lambda n: (0, 0)),
                pl.BlockSpec((C, 1), lambda n: (0, 0)),
            ],
            out_specs=pl.BlockSpec((nb, C, HW), lambda n: (n, 0, 0)),
        ),
        compiler_params=compiler_params,
    )(x3, gamma2, beta2)
    return out3.reshape(N, C, H, W)


def _run_slab_layout(x_nchw, gamma_f, beta_f, inv_count, compiler_params):
    N, C, H, W = x_nchw.shape
    HW = H * W
    count = C * HW
    dtype = x_nchw.dtype
    itemsize = jnp.dtype(dtype).itemsize

    padded = ((count + _VREG_ELEMS - 1) // _VREG_ELEMS) * _VREG_ELEMS
    R = padded // _LANE
    pad = padded - count

    # gamma/beta slabs are fetched once (block index never changes) but stay
    # resident in VMEM; account for them when sizing the per-step block.
    resident = 2 * padded * 4
    per_sample = padded * (4 * itemsize + 2 * 4)
    nb = _choose_samples_per_step(N, per_sample, padded * itemsize, resident)
    # TODO(synk): same huge-single-sample note as the channel path.

    x_flat = x_nchw.reshape(N, count)
    gamma_flat = jnp.broadcast_to(gamma_f.reshape(C, 1), (C, HW)).reshape(count)
    beta_flat = jnp.broadcast_to(beta_f.reshape(C, 1), (C, HW)).reshape(count)
    if pad:
        # Only taken when HW < 128 and count is not vreg-aligned: costs one
        # extra HBM pass on input (pad) and one on output (crop).
        x_flat = jnp.pad(x_flat, ((0, 0), (0, pad)))
        gamma_flat = jnp.pad(gamma_flat, (0, pad))
        beta_flat = jnp.pad(beta_flat, (0, pad))
    x_slab = x_flat.reshape(N, R, _LANE)
    gamma_slab = gamma_flat.reshape(R, _LANE)
    beta_slab = beta_flat.reshape(R, _LANE)

    kernel = functools.partial(_gn1_slab_kernel, inv_count=inv_count)
    out_slab = pl.pallas_call(
        kernel,
        out_shape=jax.ShapeDtypeStruct((N, R, _LANE), dtype),
        grid_spec=pltpu.PrefetchScalarGridSpec(
            num_scalar_prefetch=0,
            grid=(N // nb,),
            in_specs=[
                pl.BlockSpec((nb, R, _LANE), lambda n: (n, 0, 0)),
                pl.BlockSpec((R, _LANE), lambda n: (0, 0)),
                pl.BlockSpec((R, _LANE), lambda n: (0, 0)),
            ],
            out_specs=pl.BlockSpec((nb, R, _LANE), lambda n: (n, 0, 0)),
        ),
        compiler_params=compiler_params,
    )(x_slab, gamma_slab, beta_slab)

    out_flat = out_slab.reshape(N, padded)
    if pad:
        out_flat = out_flat[:, :count]
    return out_flat.reshape(N, C, H, W)


def layer_norm_forward(x_nchw, gamma, beta):
    """GroupNorm(num_groups=1) forward. x_nchw: (N, C, H, W)."""
    N, C, H, W = x_nchw.shape
    HW = H * W
    count = C * HW
    inv_count = 1.0 / float(count)

    gamma_f = gamma.astype(jnp.float32)
    beta_f = beta.astype(jnp.float32)

    compiler_params = pltpu.CompilerParams(
        dimension_semantics=("parallel",),
        vmem_limit_bytes=_VMEM_LIMIT_BYTES,
    )

    # Layout selection (see module docstring).
    if (C % _SUBLANE == 0) and (HW % _LANE == 0):
        return _run_channel_layout(x_nchw, gamma_f, beta_f, inv_count,
                                   compiler_params)
    if count % _VREG_ELEMS == 0:
        return _run_slab_layout(x_nchw, gamma_f, beta_f, inv_count,
                                compiler_params)
    if HW >= _LANE:
        return _run_channel_layout(x_nchw, gamma_f, beta_f, inv_count,
                                   compiler_params)
    return _run_slab_layout(x_nchw, gamma_f, beta_f, inv_count,
                            compiler_params)


def _reference(x_nchw, gamma, beta):
    # Pure-JAX reference matching nn.GroupNorm(1, C) semantics.
    N, C, H, W = x_nchw.shape
    xf = x_nchw.astype(jnp.float32).reshape(N, -1)
    mean = xf.mean(axis=1, keepdims=True)
    var = ((xf - mean) ** 2).mean(axis=1, keepdims=True)
    xhat = ((xf - mean) / jnp.sqrt(var + EPS)).reshape(N, C, H, W)
    return xhat * gamma[None, :, None, None] + beta[None, :, None, None]


def _run_case(key, shape):
    N, C, H, W = shape
    k_x, k_g, k_b = jax.random.split(key, 3)
    x = jax.random.normal(k_x, (N, C, H, W), dtype=jnp.float32)
    gamma = 1.0 + 0.1 * jax.random.normal(k_g, (C,), dtype=jnp.float32)
    beta = 0.1 * jax.random.normal(k_b, (C,), dtype=jnp.float32)

    out = layer_norm_forward(x, gamma, beta)
    jax.block_until_ready(out)

    ref = _reference(x, gamma, beta)
    assert out.shape == (N, C, H, W)
    assert jnp.max(jnp.abs(out - ref)) < 2e-4


if __name__ == "__main__":
    key = jax.random.PRNGKey(0)
    k0, k1, k2, k3 = jax.random.split(key, 4)

    # Main case from the module spec: C=4 (count % 1024 == 0 -> free slab path).
    _run_case(k0, (2, 4, 16, 16))
    # Channel-layout fast path (C % 8 == 0, HW % 128 == 0).
    _run_case(k1, (2, 8, 16, 16))
    # Ragged spatial with HW >= 128 -> channel layout, no wrapper padding.
    _run_case(k2, (3, 5, 14, 14))
    # Narrow spatial (HW < 128, unaligned count) -> padded slab fallback.
    _run_case(k3, (2, 3, 7, 7))

    print("KERNEL_OK")
</pallas_src>

<mosaic_0001>
module attributes {stable_mosaic.version = 11 : i64} {
  func.func @_gn1_slab_kernel(%arg0: i32, %arg1: memref<2x8x128xf32, #tpu.memory_space<vmem>>, %arg2: memref<8x128xf32, #tpu.memory_space<vmem>>, %arg3: memref<8x128xf32, #tpu.memory_space<vmem>>, %arg4: memref<2x8x128xf32, #tpu.memory_space<vmem>>) attributes {dimension_semantics = [#tpu.dimension_semantics<parallel>], iteration_bounds = array<i64: 1>, scalar_prefetch = 0 : i64, scratch_operands = 0 : i64, tpu.core_type = #tpu.core_type<tc>, window_params = [{transform_indices = @transform_0, window_bounds = array<i64: 2, 8, 128>}, {pipeline_mode = #tpu.pipeline_mode<synchronous>, transform_indices = @transform_1, window_bounds = array<i64: 8, 128>}, {pipeline_mode = #tpu.pipeline_mode<synchronous>, transform_indices = @transform_2, window_bounds = array<i64: 8, 128>}, {transform_indices = @transform_3, window_bounds = array<i64: 2, 8, 128>}]} {
    %c0 = arith.constant 0 : index
    %c0_0 = arith.constant 0 : index
    %c0_1 = arith.constant 0 : index
    %0 = vector.load %arg1[%c0, %c0_0, %c0_1] : memref<2x8x128xf32, #tpu.memory_space<vmem>>, vector<2x8x128xf32>
    %cst = arith.constant dense<0.000000e+00> : vector<2x8xf32>
    %1 = vector.multi_reduction <add>, %0, %cst [2] : vector<2x8x128xf32> to vector<2x8xf32>
    %2 = vector.shape_cast %1 : vector<2x8xf32> to vector<2x8x1xf32>
    %cst_2 = arith.constant dense<0.000000e+00> : vector<2x1xf32>
    %3 = vector.multi_reduction <add>, %2, %cst_2 [1] : vector<2x8x1xf32> to vector<2x1xf32>
    %4 = vector.shape_cast %3 : vector<2x1xf32> to vector<2x1x1xf32>
    %5 = arith.mulf %0, %0 : vector<2x8x128xf32>
    %cst_3 = arith.constant dense<0.000000e+00> : vector<2x8xf32>
    %6 = vector.multi_reduction <add>, %5, %cst_3 [2] : vector<2x8x128xf32> to vector<2x8xf32>
    %7 = vector.shape_cast %6 : vector<2x8xf32> to vector<2x8x1xf32>
    %cst_4 = arith.constant dense<0.000000e+00> : vector<2x1xf32>
    %8 = vector.multi_reduction <add>, %7, %cst_4 [1] : vector<2x8x1xf32> to vector<2x1xf32>
    %9 = vector.shape_cast %8 : vector<2x1xf32> to vector<2x1x1xf32>
    %cst_5 = arith.constant 9.765625E-4 : f32
    %10 = vector.broadcast %cst_5 : f32 to vector<2x1x1xf32>
    %11 = arith.mulf %4, %10 : vector<2x1x1xf32>
    %cst_6 = arith.constant 9.765625E-4 : f32
    %12 = vector.broadcast %cst_6 : f32 to vector<2x1x1xf32>
    %13 = arith.mulf %9, %12 : vector<2x1x1xf32>
    %14 = arith.mulf %11, %11 : vector<2x1x1xf32>
    %15 = arith.subf %13, %14 : vector<2x1x1xf32>
    %cst_7 = arith.constant 0.000000e+00 : f32
    %16 = vector.broadcast %cst_7 : f32 to vector<2x1x1xf32>
    %17 = arith.maximumf %15, %16 : vector<2x1x1xf32>
    %cst_8 = arith.constant 9.99999974E-6 : f32
    %18 = vector.broadcast %cst_8 : f32 to vector<2x1x1xf32>
    %19 = arith.addf %17, %18 : vector<2x1x1xf32>
    %20 = math.rsqrt %19 : vector<2x1x1xf32>
    %c0_9 = arith.constant 0 : index
    %c0_10 = arith.constant 0 : index
    %21 = vector.load %arg2[%c0_9, %c0_10] : memref<8x128xf32, #tpu.memory_space<vmem>>, vector<8x128xf32>
    %22 = vector.shape_cast %21 : vector<8x128xf32> to vector<1x8x128xf32>
    %c0_11 = arith.constant 0 : index
    %c0_12 = arith.constant 0 : index
    %23 = vector.load %arg3[%c0_11, %c0_12] : memref<8x128xf32, #tpu.memory_space<vmem>>, vector<8x128xf32>
    %24 = vector.shape_cast %23 : vector<8x128xf32> to vector<1x8x128xf32>
    %25 = vector.broadcast %11 : vector<2x1x1xf32> to vector<2x8x128xf32>
    %26 = arith.subf %0, %25 : vector<2x8x128xf32>
    %27 = vector.broadcast %20 : vector<2x1x1xf32> to vector<2x8x128xf32>
    %28 = arith.mulf %26, %27 : vector<2x8x128xf32>
    %29 = vector.broadcast %22 : vector<1x8x128xf32> to vector<2x8x128xf32>
    %30 = arith.mulf %28, %29 : vector<2x8x128xf32>
    %31 = vector.broadcast %24 : vector<1x8x128xf32> to vector<2x8x128xf32>
    %32 = arith.addf %30, %31 : vector<2x8x128xf32>
    %c0_13 = arith.constant 0 : index
    %c0_14 = arith.constant 0 : index
    %c0_15 = arith.constant 0 : index
    %33 = vector.load %arg4[%c0_13, %c0_14, %c0_15] : memref<2x8x128xf32, #tpu.memory_space<vmem>>, vector<2x8x128xf32>
    tpu.vector_store %arg4[%c0_13, %c0_14, %c0_15], %32 {strides = array<i32>} : memref<2x8x128xf32, #tpu.memory_space<vmem>>, vector<2x8x128xf32>,
    return
  }
  func.func @transform_0(%arg0: i32) -> (i32, i32, i32) {
    %c0_i32 = arith.constant 0 : i32
    %c0_i32_0 = arith.constant 0 : i32
    %c0_i32_1 = arith.constant 0 : i32
    return %arg0, %c0_i32, %c0_i32_0 : i32, i32, i32
  }
  func.func @transform_1(%arg0: i32) -> (i32, i32) {
    %c0_i32 = arith.constant 0 : i32
    %c0_i32_0 = arith.constant 0 : i32
    %c0_i32_1 = arith.constant 0 : i32
    return %c0_i32, %c0_i32_0 : i32, i32
  }
  func.func @transform_2(%arg0: i32) -> (i32, i32) {
    %c0_i32 = arith.constant 0 : i32
    %c0_i32_0 = arith.constant 0 : i32
    %c0_i32_1 = arith.constant 0 : i32
    return %c0_i32, %c0_i32_0 : i32, i32
  }
  func.func @transform_3(%arg0: i32) -> (i32, i32, i32) {
    %c0_i32 = arith.constant 0 : i32
    %c0_i32_0 = arith.constant 0 : i32
    %c0_i32_1 = arith.constant 0 : i32
    return %arg0, %c0_i32, %c0_i32_0 : i32, i32, i32
  }
}

</mosaic_0001>

<bundles_post_ra>
// kernel: tpu_custom_call.1
= control target key start
LH: loop header
LB: loop body
LE: loop exit
PB: predicated region body
PF: predicated region fallthrough
CT: control target
= control target key end

     0   :  { %8 = vsyncpa [#allocation3], 0  ;;  %s323_s0 = inlined_call_operand.hbm [shape: f32[2,8,128], index: 0, kind: input, shape index: {}]   ;;  %s324_s1 = inlined_call_operand.hbm [shape: f32[8,128], index: 1, kind: input, shape index: {}]   ;;  %s325_s2 = inlined_call_operand.hbm [shape: f32[8,128], index: 2, kind: input, shape index: {}]   ;;  %s326_s3 = inlined_call_operand.hbm [shape: f32[2,8,128], index: 3, kind: output, shape index: {}]  }
   0x1   :  { %9 = vsyncpa [#allocation6], 0 }
   0x2   :  { %10 = vsyncpa [#allocation4], 0  ;;  %s236_s12 = smov [#allocation5]   ;;  %s237_s14 = smov [#allocation2]  }
   0x3   :  { %s29_s13 = sshll.u32 %s236_s12, 4  ;;  %s16_s15 = sshll.u32 %s237_s14, 4  ;;  %s30_s13 = int_to_ptr.vmem [resolvable:$true] %s29_s13  ;;  %s262_s15 = int_to_ptr.vmem [resolvable:$true] %s16_s15 }
   0x4   :  { %s142_s18 = scalar_lea.hbm %s324_s1, 128 }
   0x5   :  { %p143_p0 = scmp.ne.s32.totalorder %s324_s1, %s142_s18  ;;  %p146_p1 = scmp.lt.u32.totalorder %s142_s18, %s324_s1 }
   0x7   :  { %p148_p2 = pnand %p146_p1, %p143_p0 }
   0x9   :  { %151 = shalt.err (!%p148_p2)
}
   0xa   :  { %s152_s23 = scalar_lea.vmem %s30_s13, 128  ;;  %p157_p4 = scmp.lt.s32.totalorder %s30_s13, %s30_s13 }
   0xb   :  { %p153_p3 = scmp.ne.s32.totalorder %s30_s13, %s152_s23  ;;  %p158_p5 = scmp.lt.s32.totalorder %s152_s23, %s152_s23 }
   0xd   :  { %p159_p6 = por %p158_p5, %p157_p4 }
   0xf   :  { %p160_p7 = pnand %p159_p6, %p153_p3 }
  0x11   :  { %163 = shalt.err (!%p160_p7)
}
  0x12   :  { %32 = dma.hbm_to_vmem [thread:$0]  %s324_s1, 128, %s30_s13, [#allocation6]  }
  0x13   :  { %s164_s28 = scalar_lea.hbm %s323_s0, 256 }
  0x14   :  { %p165_p8 = scmp.ne.s32.totalorder %s323_s0, %s164_s28  ;;  %p168_p9 = scmp.lt.u32.totalorder %s164_s28, %s323_s0 }
  0x16   :  { %p170_p10 = pnand %p168_p9, %p165_p8 }
  0x18   :  { %173 = shalt.err (!%p170_p10)
}
  0x19   :  { %s174_s6 = scalar_lea.vmem %s262_s15, 256  ;;  %p179_p12 = scmp.lt.s32.totalorder %s262_s15, %s262_s15 }
  0x1a   :  { %p175_p11 = scmp.ne.s32.totalorder %s262_s15, %s174_s6  ;;  %p180_p13 = scmp.lt.s32.totalorder %s174_s6, %s174_s6 }
  0x1c   :  { %p181_p0 = por %p180_p13, %p179_p12 }
  0x1e   :  { %p182_p1 = pnand %p181_p0, %p175_p11 }
  0x20   :  { %185 = shalt.err (!%p182_p1)
}
  0x21   :  { %s238_s1 = smov 128   ;;  %s239_s7 = smov 8  }
  0x22   :  { %22 = dma.hbm_to_vmem [thread:$0]  %s323_s0, 256, %s262_s15, [#allocation3], %s238_s1, %s238_s1, %s239_s7  }
  0x23   :  { %s240_s10 = smov [#allocation7]   ;;  %s186_s14 = scalar_lea.hbm %s325_s2, 128 }
  0x24   :  { %s39_s11 = sshll.u32 %s240_s10, 4  ;;  %p187_p2 = scmp.ne.s32.totalorder %s325_s2, %s186_s14  ;;  %s40_s11 = int_to_ptr.vmem [resolvable:$true] %s39_s11 }
  0x25   :  { %p190_p3 = scmp.lt.u32.totalorder %s186_s14, %s325_s2 }
  0x27   :  { %p192_p4 = pnand %p190_p3, %p187_p2 }
  0x29   :  { %195 = shalt.err (!%p192_p4)
}
  0x2a   :  { %s196_s20 = scalar_lea.vmem %s40_s11, 128  ;;  %p201_p6 = scmp.lt.s32.totalorder %s40_s11, %s40_s11 }
  0x2b   :  { %p197_p5 = scmp.ne.s32.totalorder %s40_s11, %s196_s20  ;;  %p202_p7 = scmp.lt.s32.totalorder %s196_s20, %s196_s20 }
  0x2d   :  { %p203_p8 = por %p202_p7, %p201_p6 }
  0x2f   :  { %p204_p9 = pnand %p203_p8, %p197_p5 }
  0x31   :  { %207 = shalt.err (!%p204_p9)
}
  0x32   :  { %42 = dma.hbm_to_vmem [thread:$0]  %s325_s2, 128, %s40_s11, [#allocation6]  }
  0x33   :  { %230 = dma.done.wait [#allocation3], 256  }
  0x34   :  { %231 = vsyncadd [#allocation3], 4294967040 }
  0x35   :  { %232 = dma.done.wait [#allocation6], 256  }
  0x36   :  { %233 = vsyncadd [#allocation6], 4294967040  ;;  %v52_v0 = vld [vmem:[#allocation2] sm:$0xff]  ;;  %v53_v1 = vld [vmem:[#allocation2 + $0x8] sm:$0xff]  ;;  %s241_s2 = smov [#allocation8]  }
  0x37   :  { %54 = vadd.xlane.f32.xlu0 %v52_v0  ;;  %v70_v2 = vmul.f32 %v52_v0, %v52_v0  ;;  %v71_v3 = vmul.f32 %v53_v1, %v53_v1  ;;  %v102_v46 = vld [vmem:[#allocation5] sm:$0xff]  ;;  %v103_v48 = vld [vmem:[#allocation7] sm:$0xff]  ;;  %s119_s21 = sshll.u32 %s241_s2, 4  ;;  %s120_s21 = int_to_ptr.vmem [resolvable:$true] %s119_s21 }
  0x38   :  { %s208_s22 = scalar_lea.vmem %s120_s21, 256  ;;  %p213_p11 = scmp.lt.s32.totalorder %s120_s21, %s120_s21 }
  0x39   :  { %72 = vadd.xlane.f32.xlu1 %v70_v2  ;;  %p209_p10 = scmp.ne.s32.totalorder %s120_s21, %s208_s22  ;;  %p214_p12 = scmp.lt.s32.totalorder %s208_s22, %s208_s22 }
  0x3b   :  { %56 = vadd.xlane.f32.xlu0 %v53_v1  ;;  %p215_p13 = por %p214_p12, %p213_p11 }
  0x3d   :  { %74 = vadd.xlane.f32.xlu1 %v71_v3  ;;  %p216_p0 = pnand %p215_p13, %p209_p10 }
  0xc4   :  { %v55_v4 = vpop.xlane.xlu0 %54 }
  0xc5   :  { %v58_v5 = vrot.slane %v55_v4, 4 }
  0xc6   :  { %v73_v6 = vpop.xlane.xlu1 %72 }
  0xc7   :  { %v59_v7 = vadd.f32 %v58_v5, %v55_v4  ;;  %v76_v8 = vrot.slane %v73_v6, 4 }
  0xc8   :  { %v57_v9 = vpop.xlane.xlu0 %56 }
  0xc9   :  { %v60_v10 = vrot.slane %v59_v7, 2  ;;  %v77_v11 = vadd.f32 %v76_v8, %v73_v6  ;;  %v64_v12 = vrot.slane %v57_v9, 4 }
  0xca   :  { %v75_v13 = vpop.xlane.xlu1 %74 }
  0xcb   :  { %v61_v14 = vadd.f32 %v60_v10, %v59_v7  ;;  %v78_v15 = vrot.slane %v77_v11, 2  ;;  %v65_v16 = vadd.f32 %v64_v12, %v57_v9  ;;  %v82_v17 = vrot.slane %v75_v13, 4 }
  0xcd   :  { %v62_v18 = vrot.slane %v61_v14, 1  ;;  %v79_v19 = vadd.f32 %v78_v15, %v77_v11  ;;  %v66_v20 = vrot.slane %v65_v16, 2  ;;  %v83_v21 = vadd.f32 %v82_v17, %v75_v13 }
  0xcf   :  { %v63_v22 = vadd.f32 %v62_v18, %v61_v14  ;;  %v80_v23 = vrot.slane %v79_v19, 1  ;;  %v67_v24 = vadd.f32 %v66_v20, %v65_v16  ;;  %v84_v25 = vrot.slane %v83_v21, 2 }
  0xd1   :  { %v88_v26 = vmul.f32 0.0009765625, %v63_v22  ;;  %v81_v27 = vadd.f32 %v80_v23, %v79_v19  ;;  %v68_v28 = vrot.slane %v67_v24, 1  ;;  %v85_v29 = vadd.f32 %v84_v25, %v83_v21 }
  0xd3   :  { %v92_v30 = vmul.f32 %v88_v26, %v88_v26  ;;  %v90_v31 = vmul.f32 0.0009765625, %v81_v27  ;;  %v69_v32 = vadd.f32 %v68_v28, %v67_v24  ;;  %v86_v33 = vrot.slane %v85_v29, 1 }
  0xd4   :  { %v104_v44 = vsub.f32 %v52_v0, %v88_v26 }
  0xd5   :  { %v94_v34 = vsub.f32 %v90_v31, %v92_v30  ;;  %v89_v35 = vmul.f32 0.0009765625, %v69_v32  ;;  %v87_v36 = vadd.f32 %v86_v33, %v85_v29 }
  0xd7   :  { %v96_v37 = vmax.f32 %v94_v34, 0.0  ;;  %v93_v38 = vmul.f32 %v89_v35, %v89_v35  ;;  %v91_v39 = vmul.f32 0.0009765625, %v87_v36  ;;  %v105_v50 = vsub.f32 %v53_v1, %v89_v35 }
  0xd9   :  { %v98_v40 = vadd.f32 1e-05, %v96_v37  ;;  %v95_v41 = vsub.f32 %v91_v39, %v93_v38 }
  0xdb   :  { %138 = vrsqrt.f32 %v98_v40  ;;  %v97_v42 = vmax.f32 %v95_v41, 0.0 }
  0xdd   :  { %v99_v43 = vadd.f32 1e-05, %v97_v42 }
  0xdf   :  { %140 = vrsqrt.f32 %v99_v43 }
  0xe5   :  { %v139_v45 = vpop.eup %138 }
  0xe6   :  { %v106_v47 = vmul.f32 %v139_v45, %v104_v44 }
  0xe8   :  { %v108_v49 = vmul.f32 %v106_v47, %v102_v46 }
  0xe9   :  { %v141_v51 = vpop.eup %140 }
  0xea   :  { %v110_v52 = vadd.f32 %v108_v49, %v103_v48  ;;  %v107_v53 = vmul.f32 %v141_v51, %v105_v50 }
  0xec   :  { %112 = vst [vmem:[#allocation8] sm:$0xff] %v110_v52  ;;  %v109_v54 = vmul.f32 %v107_v53, %v102_v46 }
  0xee   :  { %v111_v55 = vadd.f32 %v109_v54, %v103_v48 }
  0xf0   :  { %113 = vst [vmem:[#allocation8 + $0x8] sm:$0xff] %v111_v55 }
  0xf1   :  { %219 = shalt.err (!%p216_p0)
}
  0xf2   :  { %s220_s25 = scalar_lea.hbm %s326_s3, 256 }
  0xf3   :  { %p221_p1 = scmp.ne.s32.totalorder %s326_s3, %s220_s25  ;;  %p224_p2 = scmp.lt.u32.totalorder %s220_s25, %s326_s3 }
  0xf5   :  { %p226_p3 = pnand %p224_p2, %p221_p1 }
  0xf7   :  { %229 = shalt.err (!%p226_p3)
}
  0xf8   :  { %125 = dma.vmem_to_hbm [thread:$0]  %s120_s21, 256, %s326_s3, [#allocation4], %s238_s1, %s238_s1, %s239_s7  }
  0xf9   :  { %234 = dma.done.wait [#allocation4], 256  }
  0xfa   :  { %235 = vsyncadd [#allocation4], 4294967040 }
  0xfb   :  { %129 = vsyncpa [#allocation3], 1 }
  0xfc   :  { %130 = vsyncpa [#allocation6], 1 }
  0xfd   :  { %131 = vsyncpa [#allocation4], 1 }

</bundles_post_ra>
